<compile_context>
chip_gen: v6e
topology: v6e:2x2x1
jax: 0.10.0
libtpu: 0.0.40
codegen_flags: <defaults>
</compile_context>

<pallas_src>
import math

import jax
import jax.numpy as jnp
import numpy as np
from jax.experimental import pallas as pl
from jax.experimental.pallas import tpu as pltpu
from jax.scipy.linalg import block_diag as _jsp_block_diag

MASK_VALUE = 0.0
NEG_INF = -1e9


# ----------------------------------------------------------------------------- kernel
def metanet_kernel(x_ref, w1_ref, b1_ref, w2_ref, b2_ref, wvk_ref, pvk_ref,
                   sel_ref, exp_ref, pool_ref, out_ref):
    # x_ref:   (TB, CH*D)        f32   obs, channel c in lanes [c*D:(c+1)*D]
    # w1_ref:  (CH*D, CH*H)      bf16  block-diagonal W1
    # w2_ref:  (CH*H, CH*DM)     bf16  block-diagonal W2
    # wvk_ref: (CH*DM, CH*DM+CH) bf16  [block-diag wv | block-diag (wk@wq)/sqrt(dm)]
    # pvk_ref: (1, CH*DM+CH)     f32   PE + projection biases pre-folded
    # sel_ref: (CH*D, CH)        bf16  per-channel zero-count selection
    # exp_ref: (CH, CH*DM)       bf16  per-channel lane expansion (repeat x DM)
    # pool_ref:(CH*DM, DM)       bf16  channel summation (stacked identities)
    chd = x_ref.shape[1]
    ch = sel_ref.shape[1]
    dm = out_ref.shape[1]
    chdm = ch * dm
    d_per_ch = chd // ch

    x = x_ref[...]                                               # (TB, CH*D) f32

    # mask: channel is masked iff ALL its features == MASK_VALUE.
    # zero-count per channel via a tiny MXU selection matmul -> channels land on lanes.
    eq = (x == MASK_VALUE).astype(jnp.bfloat16)                  # (TB, CH*D) {0,1}
    cnt = jnp.dot(eq, sel_ref[...], preferred_element_type=jnp.float32)     # (TB, CH)
    masked = cnt >= (jnp.float32(d_per_ch) - 0.5)                # (TB, CH) bool

    # --- block-diagonal MLP: Linear -> ReLU -> Linear -> ReLU (bf16 MXU, f32 accum) ---
    h = jnp.dot(x.astype(jnp.bfloat16), w1_ref[...],
                preferred_element_type=jnp.float32) + b1_ref[...]
    h = jnp.maximum(h, 0.0)                                      # (TB, CH*H)
    h = jnp.dot(h.astype(jnp.bfloat16), w2_ref[...],
                preferred_element_type=jnp.float32) + b2_ref[...]
    h = jnp.maximum(h, 0.0)                                      # (TB, CH*DM)

    # --- fused V / attention-logit projection (PE + biases pre-folded into pvk) ---
    kv = jnp.dot(h.astype(jnp.bfloat16), wvk_ref[...],
                 preferred_element_type=jnp.float32) + pvk_ref[...]   # (TB, CH*DM+CH)
    v = kv[:, :chdm]                                             # (TB, CH*DM)
    a = kv[:, chdm:]                                             # (TB, CH)

    # --- masked softmax over channels (channels on lanes) ---
    a = jnp.where(masked, NEG_INF, a)
    amax = jnp.max(a, axis=-1, keepdims=True)                    # (TB, 1)
    ex = jnp.exp(a - amax)
    den = jnp.sum(ex, axis=-1, keepdims=True)
    w = ex * pl.reciprocal(den, approx=True)                     # softmax over CH
    w = jnp.where(masked, 0.0, w)                                # folds the final (1 - m)

    # --- expand weights across each channel's DM lanes and pool (two tiny MXU passes) ---
    wexp = jnp.dot(w.astype(jnp.bfloat16), exp_ref[...],
                   preferred_element_type=jnp.float32)           # (TB, CH*DM)
    out_ref[...] = jnp.dot((v * wexp).astype(jnp.bfloat16), pool_ref[...],
                           preferred_element_type=jnp.float32)   # (TB, DM)


# ------------------------------------------------------------------- parameter folding
def _block_diag(w, n):
    return _jsp_block_diag(*([w] * n))


def fold_params(params, ch):
    """Host-side algebraic fusion + block-diagonal expansion (done once)."""
    d, hid = params["w1"].shape
    dm = params["w2"].shape[1]
    inv_sqrt_dm = 1.0 / math.sqrt(dm)

    wkq = (params["wk"] @ params["wq"]) * inv_sqrt_dm                     # (DM, 1)
    bkq = (params["bk"] @ params["wq"]) * inv_sqrt_dm + params["bq"]      # (1, 1)
    pe = params["pe"][:ch]                                                # (CH, DM)

    w1_blk = _block_diag(params["w1"], ch)                                # (CH*D, CH*H)
    w2_blk = _block_diag(params["w2"], ch)                                # (CH*H, CH*DM)
    wv_blk = _block_diag(params["wv"], ch)                                # (CH*DM, CH*DM)
    wkq_blk = _block_diag(wkq, ch)                                        # (CH*DM, CH)
    wvk_blk = jnp.concatenate([wv_blk, wkq_blk], axis=1)                  # (CH*DM, CH*DM+CH)

    b1_blk = jnp.tile(params["b1"], (1, ch))                              # (1, CH*H)
    b2_blk = jnp.tile(params["b2"], (1, ch))                              # (1, CH*DM)
    pv = (pe @ params["wv"] + params["bv"]).reshape(1, ch * dm)           # PE folded into V bias
    pk = (pe @ wkq + bkq).reshape(1, ch)                                  # PE folded into attn bias
    pvk = jnp.concatenate([pv, pk], axis=1)                               # (1, CH*DM+CH)

    sel = _block_diag(jnp.ones((d, 1), jnp.float32), ch)                  # (CH*D, CH)
    expm = _block_diag(jnp.ones((1, dm), jnp.float32), ch)                # (CH, CH*DM)
    pool = jnp.tile(jnp.eye(dm, dtype=jnp.float32), (ch, 1))              # (CH*DM, DM)

    bf = jnp.bfloat16   # MXU operands stored bf16; biases stay f32 (added post-accumulate)
    return {
        "w1": w1_blk.astype(bf), "b1": b1_blk,
        "w2": w2_blk.astype(bf), "b2": b2_blk,
        "wvk": wvk_blk.astype(bf), "pvk": pvk,
        "sel": sel.astype(bf), "exp": expm.astype(bf), "pool": pool.astype(bf),
    }


# ---------------------------------------------------------------------------- wrapper
def _round_up(x, m):
    return ((x + m - 1) // m) * m


def metanet_forward(obs, fp, block_b=512):
    bsz, ch, d = obs.shape
    dm = fp["pool"].shape[1]
    nvk = fp["wvk"].shape[1]

    if bsz <= 8:
        tb = bsz                        # single (full) block; last dims equal array dims
    else:
        # >= 2 grid steps so both v7x TensorCores get work; keep tb a multiple of 8.
        tb = max(8, min(block_b, _round_up(pl.cdiv(bsz, 2), 8)))

    weights = [fp[k] for k in ("w1", "b1", "w2", "b2", "wvk", "pvk", "sel", "exp", "pool")]

    # VMEM budgeting: per-row footprint (double-buffered IO blocks + ~8 live f32 temps)
    # caps tb and sizes an explicit scoped-VMEM request (v7x: 64 MiB physical).
    lane = 128
    bytes_per_row = 4 * (2 * _round_up(ch * d, lane)
                         + 2 * _round_up(dm, lane)
                         + 8 * _round_up(nvk, lane))
    weight_bytes = 2 * sum(int(np.prod(w.shape)) * w.dtype.itemsize for w in weights)
    if bsz > 8:
        tb = min(tb, max(8, ((24 * 1024 * 1024 // bytes_per_row) // 8) * 8))
    vmem_limit = int(min(48 << 20,
                         max(32 << 20, tb * bytes_per_row + weight_bytes + (8 << 20))))

    obs2 = obs.reshape(bsz, ch * d)     # contiguous -> free reshape, lane-dense block

    in_specs = [pl.BlockSpec((tb, ch * d), lambda b: (b, 0))]
    in_specs += [pl.BlockSpec(w.shape, lambda b: (0, 0)) for w in weights]

    return pl.pallas_call(
        metanet_kernel,
        out_shape=jax.ShapeDtypeStruct((bsz, dm), jnp.float32),
        grid=(pl.cdiv(bsz, tb),),
        in_specs=in_specs,
        out_specs=pl.BlockSpec((tb, dm), lambda b: (b, 0)),
        compiler_params=pltpu.CompilerParams(
            dimension_semantics=("parallel",),
            vmem_limit_bytes=vmem_limit),
    )(obs2, *weights)                   # (B, DM)


# ------------------------------------------------------------------- params / reference
def make_positional_encoding(max_len, d_model):
    pe = np.zeros((max_len, d_model), dtype=np.float32)
    position = np.arange(0, max_len, dtype=np.float32)[:, None]
    div_term = np.exp(np.arange(0, d_model, 2, dtype=np.float32)
                      * (-math.log(10000.0) / d_model))
    pe[:, 0::2] = np.sin(position * div_term)
    pe[:, 1::2] = np.cos(position * div_term)
    return jnp.asarray(pe)


def init_params(key, d, hidden, d_model, ch):
    ks = jax.random.split(key, 6)
    s = 0.1
    return {
        "pe": make_positional_encoding(1000, d_model)[:ch],
        "w1": s * jax.random.normal(ks[0], (d, hidden), jnp.float32),
        "b1": jnp.zeros((1, hidden), jnp.float32),
        "w2": s * jax.random.normal(ks[1], (hidden, d_model), jnp.float32),
        "b2": jnp.zeros((1, d_model), jnp.float32),
        "wk": s * jax.random.normal(ks[2], (d_model, d_model), jnp.float32),
        "bk": 0.01 * jnp.ones((1, d_model), jnp.float32),
        "wv": s * jax.random.normal(ks[3], (d_model, d_model), jnp.float32),
        "bv": 0.01 * jnp.ones((1, d_model), jnp.float32),
        "wq": s * jax.random.normal(ks[4], (d_model, 1), jnp.float32),
        "bq": jnp.zeros((1, 1), jnp.float32),
    }


def metanet_reference(obs, p):
    bsz, ch, d = obs.shape
    dm = p["w2"].shape[1]
    mask = jnp.all(obs == MASK_VALUE, axis=2).astype(jnp.float32)   # (B, CH)
    x = obs.reshape(-1, d)
    h = jax.nn.relu(x @ p["w1"] + p["b1"])
    h = jax.nn.relu(h @ p["w2"] + p["b2"])
    logits = h.reshape(bsz, ch, dm) + p["pe"][None]
    v = logits @ p["wv"] + p["bv"]
    k = logits @ p["wk"] + p["bk"]
    attn = (k / jnp.sqrt(jnp.float32(dm))) @ p["wq"] + p["bq"]      # (B, CH, 1)
    m = mask[..., None]
    attn = (1.0 - m) * attn + m * NEG_INF
    attn = jax.nn.softmax(attn, axis=1)
    return jnp.sum(v * attn * (1.0 - m), axis=1)                    # (B, DM)


# ------------------------------------------------------------------------------- main
if __name__ == "__main__":
    B, CH, D = 16, 8, 16
    HIDDEN, D_MODEL = 32, 32

    key = jax.random.PRNGKey(0)
    k_obs, k_par = jax.random.split(key)

    obs = jax.random.normal(k_obs, (B, CH, D), jnp.float32)
    # masked (all == MASK_VALUE) rows exercise the mask path; one fully masked batch
    # element (its output must be exactly 0).
    obs = obs.at[0, CH - 1].set(MASK_VALUE)
    obs = obs.at[1, CH - 2].set(MASK_VALUE)
    obs = obs.at[5].set(MASK_VALUE)

    params = init_params(k_par, D, HIDDEN, D_MODEL, CH)
    folded = fold_params(params, CH)

    out = metanet_forward(obs, folded)          # B=16 -> tb=8, grid=(2,)
    out = jax.block_until_ready(out)

    ref = jax.block_until_ready(metanet_reference(obs, params))
    assert out.shape == (B, D_MODEL)
    # bf16 MXU operands + approx reciprocal -> compare against the f32 reference with a
    # bf16-appropriate tolerance.
    assert jnp.allclose(out, ref, atol=1e-2, rtol=1e-2), "mismatch vs JAX reference"
    assert jnp.allclose(out[5], 0.0), "fully-masked row must be zero"

    print("KERNEL_OK")
</pallas_src>

<mosaic_0001>
module attributes {stable_mosaic.version = 11 : i64} {
  func.func @metanet_kernel(%arg0: i32, %arg1: memref<8x128xf32, #tpu.memory_space<vmem>>, %arg2: memref<128x256xbf16, #tpu.memory_space<vmem>>, %arg3: memref<1x256xf32, #tpu.memory_space<vmem>>, %arg4: memref<256x256xbf16, #tpu.memory_space<vmem>>, %arg5: memref<1x256xf32, #tpu.memory_space<vmem>>, %arg6: memref<256x264xbf16, #tpu.memory_space<vmem>>, %arg7: memref<1x264xf32, #tpu.memory_space<vmem>>, %arg8: memref<128x8xbf16, #tpu.memory_space<vmem>>, %arg9: memref<8x256xbf16, #tpu.memory_space<vmem>>, %arg10: memref<256x32xbf16, #tpu.memory_space<vmem>>, %arg11: memref<8x32xf32, #tpu.memory_space<vmem>>) attributes {dimension_semantics = [#tpu.dimension_semantics<parallel>], iteration_bounds = array<i64: 2>, scalar_prefetch = 0 : i64, scratch_operands = 0 : i64, tpu.core_type = #tpu.core_type<tc>, window_params = [{transform_indices = @transform_0, window_bounds = array<i64: 8, 128>}, {pipeline_mode = #tpu.pipeline_mode<synchronous>, transform_indices = @transform_1, window_bounds = array<i64: 128, 256>}, {pipeline_mode = #tpu.pipeline_mode<synchronous>, transform_indices = @transform_2, window_bounds = array<i64: 1, 256>}, {pipeline_mode = #tpu.pipeline_mode<synchronous>, transform_indices = @transform_3, window_bounds = array<i64: 256, 256>}, {pipeline_mode = #tpu.pipeline_mode<synchronous>, transform_indices = @transform_4, window_bounds = array<i64: 1, 256>}, {pipeline_mode = #tpu.pipeline_mode<synchronous>, transform_indices = @transform_5, window_bounds = array<i64: 256, 264>}, {pipeline_mode = #tpu.pipeline_mode<synchronous>, transform_indices = @transform_6, window_bounds = array<i64: 1, 264>}, {pipeline_mode = #tpu.pipeline_mode<synchronous>, transform_indices = @transform_7, window_bounds = array<i64: 128, 8>}, {pipeline_mode = #tpu.pipeline_mode<synchronous>, transform_indices = @transform_8, window_bounds = array<i64: 8, 256>}, {pipeline_mode = #tpu.pipeline_mode<synchronous>, transform_indices = @transform_9, window_bounds = array<i64: 256, 32>}, {transform_indices = @transform_10, window_bounds = array<i64: 8, 32>}]} {
    %c0 = arith.constant 0 : index
    %c0_0 = arith.constant 0 : index
    %0 = vector.load %arg1[%c0, %c0_0] : memref<8x128xf32, #tpu.memory_space<vmem>>, vector<8x128xf32>
    %cst = arith.constant 0.000000e+00 : f32
    %1 = vector.broadcast %cst : f32 to vector<8x128xf32>
    %2 = arith.cmpf oeq, %0, %1 : vector<8x128xf32>
    %3 = arith.extui %2 : vector<8x128xi1> to vector<8x128xi32>
    %4 = arith.sitofp %3 : vector<8x128xi32> to vector<8x128xf32>
    %5 = arith.truncf %4 : vector<8x128xf32> to vector<8x128xbf16>
    %c0_1 = arith.constant 0 : index
    %c0_2 = arith.constant 0 : index
    %6 = vector.load %arg8[%c0_1, %c0_2] : memref<128x8xbf16, #tpu.memory_space<vmem>>, vector<128x8xbf16>
    %cst_3 = arith.constant dense<0.000000e+00> : vector<8x8xf32>
    %7 = tpu.matmul %5, %6, %cst_3 {dimension_numbers = #tpu.dot_dimension_numbers<[1], [0], [0], [1], [0, 0, 1, 1], [], []>} : vector<8x128xbf16>, vector<128x8xbf16>, vector<8x8xf32> -> vector<8x8xf32>
    %cst_4 = arith.constant 1.600000e+01 : f32
    %cst_5 = arith.constant 5.000000e-01 : f32
    %8 = arith.subf %cst_4, %cst_5 : f32
    %9 = vector.broadcast %8 : f32 to vector<8x8xf32>
    %10 = arith.cmpf oge, %7, %9 : vector<8x8xf32>
    %11 = arith.truncf %0 : vector<8x128xf32> to vector<8x128xbf16>
    %c0_6 = arith.constant 0 : index
    %c0_7 = arith.constant 0 : index
    %12 = vector.load %arg2[%c0_6, %c0_7] : memref<128x256xbf16, #tpu.memory_space<vmem>>, vector<128x256xbf16>
    %cst_8 = arith.constant dense<0.000000e+00> : vector<8x256xf32>
    %13 = tpu.matmul %11, %12, %cst_8 {dimension_numbers = #tpu.dot_dimension_numbers<[1], [0], [0], [1], [0, 0, 1, 1], [], []>} : vector<8x128xbf16>, vector<128x256xbf16>, vector<8x256xf32> -> vector<8x256xf32>
    %c0_9 = arith.constant 0 : index
    %c0_10 = arith.constant 0 : index
    %14 = vector.load %arg3[%c0_9, %c0_10] : memref<1x256xf32, #tpu.memory_space<vmem>>, vector<1x256xf32>
    %15 = vector.broadcast %14 : vector<1x256xf32> to vector<8x256xf32>
    %16 = arith.addf %13, %15 : vector<8x256xf32>
    %cst_11 = arith.constant 0.000000e+00 : f32
    %17 = vector.broadcast %cst_11 : f32 to vector<8x256xf32>
    %18 = arith.maximumf %16, %17 : vector<8x256xf32>
    %19 = arith.truncf %18 : vector<8x256xf32> to vector<8x256xbf16>
    %c0_12 = arith.constant 0 : index
    %c0_13 = arith.constant 0 : index
    %20 = vector.load %arg4[%c0_12, %c0_13] : memref<256x256xbf16, #tpu.memory_space<vmem>>, vector<256x256xbf16>
    %cst_14 = arith.constant dense<0.000000e+00> : vector<8x256xf32>
    %21 = tpu.matmul %19, %20, %cst_14 {dimension_numbers = #tpu.dot_dimension_numbers<[1], [0], [0], [1], [0, 0, 1, 1], [], []>} : vector<8x256xbf16>, vector<256x256xbf16>, vector<8x256xf32> -> vector<8x256xf32>
    %c0_15 = arith.constant 0 : index
    %c0_16 = arith.constant 0 : index
    %22 = vector.load %arg5[%c0_15, %c0_16] : memref<1x256xf32, #tpu.memory_space<vmem>>, vector<1x256xf32>
    %23 = vector.broadcast %22 : vector<1x256xf32> to vector<8x256xf32>
    %24 = arith.addf %21, %23 : vector<8x256xf32>
    %cst_17 = arith.constant 0.000000e+00 : f32
    %25 = vector.broadcast %cst_17 : f32 to vector<8x256xf32>
    %26 = arith.maximumf %24, %25 : vector<8x256xf32>
    %27 = arith.truncf %26 : vector<8x256xf32> to vector<8x256xbf16>
    %c0_18 = arith.constant 0 : index
    %c0_19 = arith.constant 0 : index
    %28 = vector.load %arg6[%c0_18, %c0_19] : memref<256x264xbf16, #tpu.memory_space<vmem>>, vector<256x264xbf16>
    %cst_20 = arith.constant dense<0.000000e+00> : vector<8x264xf32>
    %29 = tpu.matmul %27, %28, %cst_20 {dimension_numbers = #tpu.dot_dimension_numbers<[1], [0], [0], [1], [0, 0, 1, 1], [], []>} : vector<8x256xbf16>, vector<256x264xbf16>, vector<8x264xf32> -> vector<8x264xf32>
    %c0_21 = arith.constant 0 : index
    %c0_22 = arith.constant 0 : index
    %30 = vector.load %arg7[%c0_21, %c0_22] : memref<1x264xf32, #tpu.memory_space<vmem>>, vector<1x264xf32>
    %31 = vector.broadcast %30 : vector<1x264xf32> to vector<8x264xf32>
    %32 = arith.addf %29, %31 : vector<8x264xf32>
    %33 = vector.extract_strided_slice %32 {offsets = [0, 0], sizes = [8, 256], strides = [1, 1]} : vector<8x264xf32> to vector<8x256xf32>
    %34 = vector.extract_strided_slice %32 {offsets = [0, 256], sizes = [8, 8], strides = [1, 1]} : vector<8x264xf32> to vector<8x8xf32>
    %cst_23 = arith.constant -1.000000e+09 : f32
    %35 = vector.broadcast %cst_23 : f32 to vector<8x8xf32>
    %36 = arith.select %10, %35, %34 : vector<8x8xi1>, vector<8x8xf32>
    %cst_24 = arith.constant dense<0xFF800000> : vector<8xf32>
    %37 = vector.multi_reduction <maximumf>, %36, %cst_24 [1] : vector<8x8xf32> to vector<8xf32>
    %38 = vector.shape_cast %37 : vector<8xf32> to vector<8x1xf32>
    %39 = vector.broadcast %38 : vector<8x1xf32> to vector<8x8xf32>
    %40 = arith.subf %36, %39 : vector<8x8xf32>
    %41 = math.exp %40 : vector<8x8xf32>
    %cst_25 = arith.constant dense<0.000000e+00> : vector<8xf32>
    %42 = vector.multi_reduction <add>, %41, %cst_25 [1] : vector<8x8xf32> to vector<8xf32>
    %43 = vector.shape_cast %42 : vector<8xf32> to vector<8x1xf32>
    %44 = tpu.reciprocal %43 {approx = true} : vector<8x1xf32> -> vector<8x1xf32>
    %45 = vector.broadcast %44 : vector<8x1xf32> to vector<8x8xf32>
    %46 = arith.mulf %41, %45 : vector<8x8xf32>
    %cst_26 = arith.constant 0.000000e+00 : f32
    %47 = vector.broadcast %cst_26 : f32 to vector<8x8xf32>
    %48 = arith.select %10, %47, %46 : vector<8x8xi1>, vector<8x8xf32>
    %49 = arith.truncf %48 : vector<8x8xf32> to vector<8x8xbf16>
    %c0_27 = arith.constant 0 : index
    %c0_28 = arith.constant 0 : index
    %50 = vector.load %arg9[%c0_27, %c0_28] : memref<8x256xbf16, #tpu.memory_space<vmem>>, vector<8x256xbf16>
    %cst_29 = arith.constant dense<0.000000e+00> : vector<8x256xf32>
    %51 = tpu.matmul %49, %50, %cst_29 {dimension_numbers = #tpu.dot_dimension_numbers<[1], [0], [0], [1], [0, 0, 1, 1], [], []>} : vector<8x8xbf16>, vector<8x256xbf16>, vector<8x256xf32> -> vector<8x256xf32>
    %52 = arith.mulf %33, %51 : vector<8x256xf32>
    %53 = arith.truncf %52 : vector<8x256xf32> to vector<8x256xbf16>
    %c0_30 = arith.constant 0 : index
    %c0_31 = arith.constant 0 : index
    %54 = vector.load %arg10[%c0_30, %c0_31] : memref<256x32xbf16, #tpu.memory_space<vmem>>, vector<256x32xbf16>
    %cst_32 = arith.constant dense<0.000000e+00> : vector<8x32xf32>
    %55 = tpu.matmul %53, %54, %cst_32 {dimension_numbers = #tpu.dot_dimension_numbers<[1], [0], [0], [1], [0, 0, 1, 1], [], []>} : vector<8x256xbf16>, vector<256x32xbf16>, vector<8x32xf32> -> vector<8x32xf32>
    %c0_33 = arith.constant 0 : index
    %c0_34 = arith.constant 0 : index
    %56 = vector.load %arg11[%c0_33, %c0_34] : memref<8x32xf32, #tpu.memory_space<vmem>>, vector<8x32xf32>
    tpu.vector_store %arg11[%c0_33, %c0_34], %55 {strides = array<i32>} : memref<8x32xf32, #tpu.memory_space<vmem>>, vector<8x32xf32>,
    return
  }
  func.func @transform_0(%arg0: i32) -> (i32, i32) {
    %c0_i32 = arith.constant 0 : i32
    %c0_i32_0 = arith.constant 0 : i32
    return %arg0, %c0_i32 : i32, i32
  }
  func.func @transform_1(%arg0: i32) -> (i32, i32) {
    %c0_i32 = arith.constant 0 : i32
    %c0_i32_0 = arith.constant 0 : i32
    %c0_i32_1 = arith.constant 0 : i32
    return %c0_i32, %c0_i32_0 : i32, i32
  }
  func.func @transform_2(%arg0: i32) -> (i32, i32) {
    %c0_i32 = arith.constant 0 : i32
    %c0_i32_0 = arith.constant 0 : i32
    %c0_i32_1 = arith.constant 0 : i32
    return %c0_i32, %c0_i32_0 : i32, i32
  }
  func.func @transform_3(%arg0: i32) -> (i32, i32) {
    %c0_i32 = arith.constant 0 : i32
    %c0_i32_0 = arith.constant 0 : i32
    %c0_i32_1 = arith.constant 0 : i32
    return %c0_i32, %c0_i32_0 : i32, i32
  }
  func.func @transform_4(%arg0: i32) -> (i32, i32) {
    %c0_i32 = arith.constant 0 : i32
    %c0_i32_0 = arith.constant 0 : i32
    %c0_i32_1 = arith.constant 0 : i32
    return %c0_i32, %c0_i32_0 : i32, i32
  }
  func.func @transform_5(%arg0: i32) -> (i32, i32) {
    %c0_i32 = arith.constant 0 : i32
    %c0_i32_0 = arith.constant 0 : i32
    %c0_i32_1 = arith.constant 0 : i32
    return %c0_i32, %c0_i32_0 : i32, i32
  }
  func.func @transform_6(%arg0: i32) -> (i32, i32) {
    %c0_i32 = arith.constant 0 : i32
    %c0_i32_0 = arith.constant 0 : i32
    %c0_i32_1 = arith.constant 0 : i32
    return %c0_i32, %c0_i32_0 : i32, i32
  }
  func.func @transform_7(%arg0: i32) -> (i32, i32) {
    %c0_i32 = arith.constant 0 : i32
    %c0_i32_0 = arith.constant 0 : i32
    %c0_i32_1 = arith.constant 0 : i32
    return %c0_i32, %c0_i32_0 : i32, i32
  }
  func.func @transform_8(%arg0: i32) -> (i32, i32) {
    %c0_i32 = arith.constant 0 : i32
    %c0_i32_0 = arith.constant 0 : i32
    %c0_i32_1 = arith.constant 0 : i32
    return %c0_i32, %c0_i32_0 : i32, i32
  }
  func.func @transform_9(%arg0: i32) -> (i32, i32) {
    %c0_i32 = arith.constant 0 : i32
    %c0_i32_0 = arith.constant 0 : i32
    %c0_i32_1 = arith.constant 0 : i32
    return %c0_i32, %c0_i32_0 : i32, i32
  }
  func.func @transform_10(%arg0: i32) -> (i32, i32) {
    %c0_i32 = arith.constant 0 : i32
    %c0_i32_0 = arith.constant 0 : i32
    return %arg0, %c0_i32 : i32, i32
  }
}

</mosaic_0001>

<bundles_post_ra>
// kernel: tpu_custom_call.1
= control target key start
LH: loop header
LB: loop body
LE: loop exit
PB: predicated region body
PF: predicated region fallthrough
CT: control target
= control target key end

     0   :  { %15 = vsyncpa [#allocation3], 0  ;;  %s2656_s0 = inlined_call_operand.vmem [shape: f32[16,128], index: 0, kind: input, shape index: {}]   ;;  %s2657_s1 = inlined_call_operand.vmem [shape: bf16[128,256], index: 1, kind: input, shape index: {}]   ;;  %s2658_s2 = inlined_call_operand.vmem [shape: f32[1,256], index: 2, kind: input, shape index: {}]   ;;  %s2659_s3 = inlined_call_operand.vmem [shape: bf16[256,256], index: 3, kind: input, shape index: {}]   ;;  %s2660_s4 = inlined_call_operand.vmem [shape: f32[1,256], index: 4, kind: input, shape index: {}]   ;;  %s2661_s5 = inlined_call_operand.vmem [shape: bf16[256,264], index: 5, kind: input, shape index: {}]   ;;  %s2662_s6 = inlined_call_operand.vmem [shape: f32[1,264], index: 6, kind: input, shape index: {}]   ;;  %s2663_s7 = inlined_call_operand.vmem [shape: bf16[128,8], index: 7, kind: input, shape index: {}]   ;;  %s2664_s8 = inlined_call_operand.vmem [shape: bf16[8,256], index: 8, kind: input, shape index: {}]   ;;  %s2665_s9 = inlined_call_operand.vmem [shape: bf16[256,32], index: 9, kind: input, shape index: {}]   ;;  %s2666_s10 = inlined_call_operand.hbm [shape: f32[16,32], index: 10, kind: output, shape index: {}]  }
   0x1   :  { %17 = vsyncpa [#allocation3 + $0x1], 0  ;;  %s2147_s13 = smov 0   ;;  %s2149_s14 = smov 0  }
   0x2   :  { %s2151_s15 = smov 0   ;;  %s2153_s16 = smov 0  }
   0x3 LB: > { %s2168_s17 = sadd.s32 4294967295, %s2085_s16   ;;  %s1606_s18 = sadd.s32 4294967294, %s2085_s16   ;;  %s2085_s16 = sphi %s2153_s16, %s2674_s16   ;;  %s2081_s15 = sphi %s2151_s15, %s2673_s15   ;;  %s2077_s14 = sphi %s2149_s14, %s2672_s14   ;;  %s2073_s13 = sphi %s2147_s13, %s2671_s13  }
   0x4   : > { %s2172_s19 = sadd.s32 1, %s2085_s16   ;;  %s245_s20 = sadd.s32 1, %s2081_s15 }
   0x5   : > { %s242_s21 = ssub.s32 %s2085_s16, %s2172_s19  ;;  %p255_p0 = scmp.ne.s32.totalorder %s2081_s15, %s2077_s14 }
   0x6   : > { %p243_p1 = scmp.eq.s32.totalorder %s242_s21, 0  ;;  %p256_p2 = scmp.eq.s32.totalorder %s2168_s17, 1 }
   0x7   : > { %p261_p3 = scmp.ne.s32.totalorder %s2077_s14, %s2073_s13  ;;  %p262_p4 = scmp.eq.s32.totalorder %s1606_s18, 1 }
   0x8   : > { %s2183_s22 = scalar_select %p243_p1, %s2081_s15, %s245_s20  }
   0x9   : > { %p2185_p5 = por %p256_p2, %p255_p0  ;;  %p2189_p6 = por %p262_p4, %p261_p3 }
   0xa   : > { %2667 = sst [smem:[#allocation5_spill]] %s2183_s22  ;;  %p1609_p7 = scmp.ge.s32.totalorder %s2085_s16, 1 }
   0xb   : > { %p314_p8 = scmp.lt.s32.totalorder %s2085_s16, 3 }
   0xd   : > { %p315_p9 = pnand %p1609_p7, %p314_p8 }
   0xe   : > { %p351_p10 = scmp.lt.s32.totalorder (!%p315_p9), %s2168_s17, 1  ;;  %s1740_s11 = sshll.u32 (!%p315_p9), %s2168_s17, 7 }
   0xf   : > { %318 = sbr.rel (%p315_p9) target bundleno = 1383 (0x567), region = 60  ;;  %s2615_s21 = scalar_lea.hbm (!%p315_p9), %s2666_s10, %s1740_s11 }
  0x10   : > { %s2091_s27 = smov (!%p315_p9), [#allocation2]  }
  0x11   : > { %s2029_s28 = sshll.u32 (!%p315_p9), %s2091_s27, 4  ;;  %s2030_s28 = int_to_ptr.vmem [resolvable:$false] %s2029_s28 }
  0x12   : > { %s2031_s30 = scalar_lea.vmem (!%p315_p9), %s2030_s28, 256 }
  0x14   : > { %v1859_v0 = vld [vmem:[%s2657_s1 + $0x74] ss:$8 sps:$4 sm:$0xff]   ;;  %v1861_v1 = vld [vmem:[%s2657_s1 + $0x70] ss:$8 sps:$4 sm:$0xff]   ;;  %v2087_v2 = vmov 0   ;;  %v2088_v4 = vmov 0.0  }
  0x15   : > { %607 = vmatprep.mubr.bf16.mxu1 %v2087_v2  ;;  %575 = vmatprep.subr.bf16.mxu1 %v1859_v0  ;;  %v1862_v3 = vld [vmem:[%s2657_s1 + $0x64] ss:$8 sps:$4 sm:$0xff]   ;;  %v1864_v5 = vld [vmem:[%s2657_s1 + $0x60] ss:$8 sps:$4 sm:$0xff]   ;;  %vm2089_vm0 = vmmov 0   ;;  %v1883_v10 = vld [vmem:[%s2663_s7 + $0x38] sm:$0xff]  }
  0x16   : > { %1796 = vmatprep.subr.bf16.mxu0 %v2088_v4  ;;  %576 = vmatpush1.bf16.msra.mxu1 %v1861_v1  ;;  %v1865_v6 = vld [vmem:[%s2657_s1 + $0x54] ss:$8 sps:$4 sm:$0xff]   ;;  %v1867_v7 = vld [vmem:[%s2657_s1 + $0x50] ss:$8 sps:$4 sm:$0xff]   ;;  %v1868_v8 = vld [vmem:[%s2657_s1 + $0x44] ss:$8 sps:$4 sm:$0xff]  }
  0x17   : > { %1812 = vmatprep.mubr.msk.bf16.mxu0 %vm2089_vm0, %v2088_v4  ;;  %577 = vmatprep.subr.bf16.mxu1 %v1862_v3  ;;  %v1870_v9 = vld [vmem:[%s2657_s1 + $0x40] ss:$8 sps:$4 sm:$0xff]   ;;  %v1871_v11 = vld [vmem:[%s2657_s1 + $0x34] ss:$8 sps:$4 sm:$0xff]   ;;  %v1873_v13 = vld [vmem:[%s2657_s1 + $0x30] ss:$8 sps:$4 sm:$0xff]  }
  0x18   : > { %1797 = vmatpush3.bf16.msra.mxu0 %v1883_v10  ;;  %v1884_v12 = vld [vmem:[%s2663_s7 + $0x30] sm:$0xff]   ;;  %v1874_v14 = vld [vmem:[%s2657_s1 + $0x24] ss:$8 sps:$4 sm:$0xff]   ;;  %s352_s29 = scalar_select %p351_p10, %s2168_s17, 1  ;;  %v1876_v16 = vld [vmem:[%s2657_s1 + $0x20] ss:$8 sps:$4 sm:$0xff]  }
  0x19   : > { %1798 = vmatprep.subr.bf16.mxu0 %v2088_v4  ;;  %v1885_v15 = vld [vmem:[%s2663_s7 + $0x28] sm:$0xff]   ;;  %v1877_v17 = vld [vmem:[%s2657_s1 + $0x14] ss:$8 sps:$4 sm:$0xff]   ;;  %v1886_v18 = vld [vmem:[%s2663_s7 + $0x20] sm:$0xff]   ;;  %v2090_v32 = vmov 1.0|1.0  }
  0x1a   : > { %578 = vmatpush1.bf16.msra.mxu1 %v1864_v5  ;;  %s1611_s25 = sshll.u32 %s352_s29, 3  ;;  %v1879_v19 = vld [vmem:[%s2657_s1 + $0x10] ss:$8 sps:$4 sm:$0xff]   ;;  %v1880_v20 = vld [vmem:[%s2657_s1 + $0x4] ss:$8 sps:$4 sm:$0xff]   ;;  %vm1288_vm3 = vcmask 64512  }
  0x1b   : > { %579 = vmatprep.subr.bf16.mxu1 %v1865_v6  ;;  %s354_s29 = scalar_lea.vmem %s2656_s0, %s1611_s25  ;;  %v1887_v21 = vld [vmem:[%s2663_s7 + $0x18] sm:$0xff]   ;;  %v1882_v22 = vld [vmem:[%s2657_s1] ss:$8 sps:$4 sm:$0xff]   ;;  %v1888_v24 = vld [vmem:[%s2663_s7 + $0x10] sm:$0xff]   ;;  %vm1311_vm5 = vcmask 1043456   ;;  %s348_s25 = sand.u32 1, %s2077_s14  }
  0x1c   : > { %1799 = vmatpush3.bf16.msra.mxu0 %v1884_v12  ;;  %v356_v23 = vld [vmem:[%s354_s29] sm:$0xff]  ;;  %v1889_v26 = vld [vmem:[%s2663_s7 + $0x8] sm:$0xff]   ;;  %v1893_v28 = vld [vmem:[%s2659_s3 + $0x74] ss:$8 sps:$4 sm:$0xff]   ;;  %s1610_s22 = sshll.u32 %s348_s25, 3  ;;  %vm1531_vm6 = vcmask 261120  }
  0x1d   : > { %1800 = vmatprep.subr.bf16.mxu0 %v2088_v4  ;;  %v466_v25 = vpack.c.bf16 %v356_v23, %v356_v23  ;;  %vm357_vm1 = vcmp.eq.f32.partialorder %v356_v23, 0.0  ;;  %v1890_v27 = vld [vmem:[%s2663_s7] sm:$0xff]   ;;  %v1891_v29 = vld [vmem:[%s2659_s3 + $0x70] ss:$8 sps:$4 sm:$0xff]   ;;  %v1899_v33 = vld [vmem:[%s2659_s3 + $0x54] ss:$8 sps:$4 sm:$0xff]  }
  0x1e   : > { %580 = vmatpush1.bf16.msra.mxu1 %v1867_v7  ;;  %vm1621_vm2 = vmpackc.low %vm357_vm1, %vm357_vm1  ;;  %v1896_v30 = vld [vmem:[%s2659_s3 + $0x64] ss:$8 sps:$4 sm:$0xff]   ;;  %v1894_v31 = vld [vmem:[%s2659_s3 + $0x60] ss:$8 sps:$4 sm:$0xff]   ;;  %s350_s12 = scalar_lea.vmem [#allocation2], %s1610_s22  ;;  %s1534_s26 = scalar_lea.sflag [#allocation3], %s348_s25 }
  0x1f   : > { %581 = vmatprep.subr.bf16.mxu1 %v1868_v8  ;;  %v1897_v34 = vld [vmem:[%s2659_s3 + $0x50] ss:$8 sps:$4 sm:$0xff]   ;;  %v1902_v35 = vld [vmem:[%s2659_s3 + $0x44] ss:$8 sps:$4 sm:$0xff]   ;;  %v1900_v36 = vld [vmem:[%s2659_s3 + $0x40] ss:$8 sps:$4 sm:$0xff]  }
  0x20   : > { %1801 = vmatpush3.bf16.msra.mxu0 %v1885_v15  ;;  %v1905_v37 = vld [vmem:[%s2659_s3 + $0x34] ss:$8 sps:$4 sm:$0xff]   ;;  %v1903_v38 = vld [vmem:[%s2659_s3 + $0x30] ss:$8 sps:$4 sm:$0xff]   ;;  %v1908_v39 = vld [vmem:[%s2659_s3 + $0x24] ss:$8 sps:$4 sm:$0xff]  }
  0x21   : > { %1802 = vmatprep.subr.bf16.mxu0 %v2088_v4  ;;  %v1906_v40 = vld [vmem:[%s2659_s3 + $0x20] ss:$8 sps:$4 sm:$0xff]   ;;  %v1911_v41 = vld [vmem:[%s2659_s3 + $0x14] ss:$8 sps:$4 sm:$0xff]   ;;  %v1909_v42 = vld [vmem:[%s2659_s3 + $0x10] ss:$8 sps:$4 sm:$0xff]  }
  0x22   : > { %582 = vmatpush1.bf16.msra.mxu1 %v1870_v9  ;;  %v1914_v43 = vld [vmem:[%s2659_s3 + $0x4] ss:$8 sps:$4 sm:$0xff]   ;;  %v1912_v44 = vld [vmem:[%s2659_s3] ss:$8 sps:$4 sm:$0xff]   ;;  %v1917_v45 = vld [vmem:[%s2659_s3 + $0xf4] ss:$8 sps:$4 sm:$0xff]  }
  0x23   : > { %583 = vmatprep.subr.bf16.mxu1 %v1871_v11  ;;  %v1915_v46 = vld [vmem:[%s2659_s3 + $0xf0] ss:$8 sps:$4 sm:$0xff]   ;;  %v1920_v47 = vld [vmem:[%s2659_s3 + $0xe4] ss:$8 sps:$4 sm:$0xff]   ;;  %v1918_v48 = vld [vmem:[%s2659_s3 + $0xe0] ss:$8 sps:$4 sm:$0xff]  }
  0x24   : > { %1803 = vmatpush3.bf16.msra.mxu0 %v1886_v18  ;;  %v1923_v49 = vld [vmem:[%s2659_s3 + $0xd4] ss:$8 sps:$4 sm:$0xff]   ;;  %v1921_v50 = vld [vmem:[%s2659_s3 + $0xd0] ss:$8 sps:$4 sm:$0xff]   ;;  %v1926_v51 = vld [vmem:[%s2659_s3 + $0xc4] ss:$8 sps:$4 sm:$0xff]  }
  0x25   : > { %1804 = vmatprep.subr.bf16.mxu0 %v2088_v4  ;;  %v1924_v52 = vld [vmem:[%s2659_s3 + $0xc0] ss:$8 sps:$4 sm:$0xff]   ;;  %v1929_v53 = vld [vmem:[%s2659_s3 + $0xb4] ss:$8 sps:$4 sm:$0xff]   ;;  %v1927_v54 = vld [vmem:[%s2659_s3 + $0xb0] ss:$8 sps:$4 sm:$0xff]  }
  0x26   : > { %584 = vmatpush1.bf16.msra.mxu1 %v1873_v13  ;;  %v1932_v55 = vld [vmem:[%s2659_s3 + $0xa4] ss:$8 sps:$4 sm:$0xff]   ;;  %v1930_v56 = vld [vmem:[%s2659_s3 + $0xa0] ss:$8 sps:$4 sm:$0xff]   ;;  %v1935_v57 = vld [vmem:[%s2659_s3 + $0x94] ss:$8 sps:$4 sm:$0xff]  }
  0x27   : > { %585 = vmatprep.subr.bf16.mxu1 %v1874_v14  ;;  %v1933_v58 = vld [vmem:[%s2659_s3 + $0x90] ss:$8 sps:$4 sm:$0xff]   ;;  %v1938_v59 = vld [vmem:[%s2659_s3 + $0x84] ss:$8 sps:$4 sm:$0xff]   ;;  %v1936_v60 = vld [vmem:[%s2659_s3 + $0x80] ss:$8 sps:$4 sm:$0xff]  }
  0x28   : > { %1805 = vmatpush3.bf16.msra.mxu0 %v1887_v21  ;;  %v1939_v61 = vld [vmem:[%s2661_s5 + $0xa8] ss:$12 sps:$4 sm:$0xff]   ;;  %v1941_v62 = vld [vmem:[%s2661_s5 + $0xac] ss:$12 sps:$4 sm:$0xff]   ;;  %v1942_v0 = vld [vmem:[%s2661_s5 + $0x90] ss:$12 sps:$4 sm:$0xff]  }
  0x29   : > { %1806 = vmatprep.subr.bf16.mxu0 %v2088_v4  ;;  %v1944_v63 = vld [vmem:[%s2661_s5 + $0x94] ss:$12 sps:$4 sm:$0xff]   ;;  %v1947_v1 = vld [vmem:[%s2661_s5 + $0x7c] ss:$12 sps:$4 sm:$0xff]   ;;  %v1950_v5 = vld [vmem:[%s2661_s5 + $0x64] ss:$12 sps:$4 sm:$0xff]  }
  0x2a   : > { %586 = vmatpush1.bf16.msra.mxu1 %v1876_v16  ;;  %v1966_v3 = vld [vmem:[%s2661_s5 + $0x170] ss:$12 sps:$4 sm:$0xff]   ;;  %v1948_v6 = vld [vmem:[%s2661_s5 + $0x60] ss:$12 sps:$4 sm:$0xff]   ;;  %v1951_v8 = vld [vmem:[%s2661_s5 + $0x48] ss:$12 sps:$4 sm:$0xff]  }
  0x2b   : > { %587 = vmatprep.subr.bf16.mxu1 %v1877_v17  ;;  %v1953_v7 = vld [vmem:[%s2661_s5 + $0x4c] ss:$12 sps:$4 sm:$0xff]   ;;  %v1956_v9 = vld [vmem:[%s2661_s5 + $0x34] ss:$12 sps:$4 sm:$0xff]   ;;  %v1954_v10 = vld [vmem:[%s2661_s5 + $0x30] ss:$12 sps:$4 sm:$0xff]  }
  0x2c   : > { %1807 = vmatpush3.bf16.msra.mxu0 %v1888_v24  ;;  %v1959_v11 = vld [vmem:[%s2661_s5 + $0x1c] ss:$12 sps:$4 sm:$0xff]   ;;  %v1957_v12 = vld [vmem:[%s2661_s5 + $0x18] ss:$12 sps:$4 sm:$0xff]   ;;  %v1960_v14 = vld [vmem:[%s2661_s5] ss:$12 sps:$4 sm:$0xff]  }
  0x2d   : > { %1808 = vmatprep.subr.bf16.mxu0 %v2088_v4  ;;  %v1962_v13 = vld [vmem:[%s2661_s5 + $0x4] ss:$12 sps:$4 sm:$0xff]   ;;  %v1965_v15 = vld [vmem:[%s2661_s5 + $0x16c] ss:$12 sps:$4 sm:$0xff]   ;;  %v1963_v16 = vld [vmem:[%s2661_s5 + $0x168] ss:$12 sps:$4 sm:$0xff]  }
  0x2e   : > { %588 = vmatpush1.bf16.msra.mxu1 %v1879_v19  ;;  %v1970_v17 = vld [vmem:[%s2661_s5 + $0x154] ss:$12 sps:$4 sm:$0xff]   ;;  %v1968_v18 = vld [vmem:[%s2661_s5 + $0x150] ss:$12 sps:$4 sm:$0xff]   ;;  %v1985_v23 = vld [vmem:[%s2661_s5 + $0x10c] ss:$12 sps:$4 sm:$0xff]  }
  0x2f   : > { %589 = vmatprep.subr.bf16.mxu1 %v1880_v20  ;;  %v1975_v19 = vld [vmem:[%s2661_s5 + $0x13c] ss:$12 sps:$4 sm:$0xff]   ;;  %v1973_v20 = vld [vmem:[%s2661_s5 + $0x138] ss:$12 sps:$4 sm:$0xff]   ;;  %s1547_s18 = sshll.u32 %s350_s12, 4  ;;  %s2617_s18 = int_to_ptr.vmem [resolvable:$true] %s1547_s18 }
  0x30   : > { %1809 = vmatpush3.bf16.msra.mxu0 %v1889_v26  ;;  %v1980_v21 = vld [vmem:[%s2661_s5 + $0x124] ss:$12 sps:$4 sm:$0xff]   ;;  %v1983_v24 = vld [vmem:[%s2661_s5 + $0x108] ss:$12 sps:$4 sm:$0xff]   ;;  %s2025_s17 = scalar_lea.vmem %s2617_s18, 128  ;;  %p2032_p0 = scmp.lt.s32.totalorder %s2617_s18, %s2030_s28 }
  0x31   : > { %1810 = vmatprep.subr.bf16.mxu0 %v2088_v4  ;;  %v1945_v4 = vld [vmem:[%s2661_s5 + $0x78] ss:$12 sps:$4 sm:$0xff]   ;;  %v1988_v26 = vld [vmem:[%s2661_s5 + $0xf0] ss:$12 sps:$4 sm:$0xff]   ;;  %p2026_p11 = scmp.ne.s32.totalorder %s2617_s18, %s2025_s17  ;;  %p2033_p1 = scmp.lt.s32.totalorder %s2031_s30, %s2025_s17 }
  0x32   : > { %590 = vmatpush1.bf16.msra.mxu1 %v1882_v22  ;;  %v1978_v22 = vld [vmem:[%s2661_s5 + $0x120] ss:$12 sps:$4 sm:$0xff]  }
  0x33   : > { %1206 = vmatprep.subr.bf16.mxu1 %v1941_v62  ;;  %v1997_v62 = vld [vmem:[%s2661_s5 + $0x20] ss:$12 sps:$4 sm:$0xff]   ;;  %p2027_p12 = pnand %p2026_p11, %p2185_p5  ;;  %p2034_p2 = por %p2033_p1, %p2032_p0 }
  0x34   : > { %1811 = vmatpush3.bf16.msra.mxu0 %v1890_v27  ;;  %v485_v27 = vlaneseq }
  0x35   : > { %608 = vmatmul.mubr.bf16.vlgmr.msra.gmra.mxu1 %v466_v25  ;;  %824 = vmatprep.subr.bf16.mxu0 %v1893_v28  ;;  %v1990_v25 = vld [vmem:[%s2661_s5 + $0xf4] ss:$12 sps:$4 sm:$0xff]   ;;  %p2028_p13 = pneg %p2027_p12 }
  0x36   : > { %1207 = vmatpush1.bf16.msra.mxu1 %v1939_v61  ;;  %v2456_v28 = vshrl.u32 %v485_v27, 7  ;;  %v1993_v61 = vld [vmem:[%s2661_s5 + $0xd8] ss:$12 sps:$4 sm:$0xff]  }
  0x37   : > { %1813 = vmatmul.mubr.msk.bf16.vlgmr.msra.gmra.mxu0 %vm1621_vm2, %v2090_v32  ;;  %1208 = vmatprep.subr.bf16.mxu1 %v1944_v63  ;;  %v2000_v63 = vld [vmem:[%s2661_s5 + $0xc4] ss:$12 sps:$4 sm:$0xff]   ;;  %p2035_p3 = pnand %p2034_p2, %p2028_p13 }
  0x38   : > { %825 = vmatpush1.bf16.msra.mxu0 %v1891_v29  ;;  %v2459_v29 = vsub.s32 0, %v2456_v28 }
  0x39   : > { %826 = vmatprep.subr.bf16.mxu0 %v1896_v30  ;;  %v483_v30 = vld [vmem:[%s2658_s2] sm:$0x3] }
  0x3a   : > { %1209 = vmatpush1.bf16.msra.mxu1 %v1942_v0  ;;  %v488_v32 = vrot.slane %v483_v30, %v2459_v29  ;;  %v2001_v0 = vld [vmem:[%s2661_s5 + $0xc8] ss:$12 sps:$4 sm:$0xff]  }
  0x3b   : > { %1210 = vmatprep.subr.bf16.mxu1 %v1947_v1  ;;  %v1998_v1 = vld [vmem:[%s2661_s5 + $0xc0] ss:$12 sps:$4 sm:$0xff]  }
  0x3c   : > { %827 = vmatpush1.bf16.msra.mxu0 %v1894_v31  ;;  %v2465_v31 = vsub.s32 1, %v2456_v28 }
  0x3d   : > { %828 = vmatprep.subr.bf16.mxu0 %v1899_v33 }
  0x3e   : > { %1211 = vmatpush1.bf16.msra.mxu1 %v1945_v4  ;;  %v492_v33 = vrot.slane %v483_v30, %v2465_v31  ;;  %v652_v4 = vld [vmem:[%s2660_s4] sm:$0x3] }
  0x3f   : > { %1212 = vmatprep.subr.bf16.mxu1 %v1950_v5  ;;  %v657_v5 = vrot.slane %v652_v4, %v2459_v29 }
  0x40   : > { %829 = vmatpush1.bf16.msra.mxu0 %v1897_v34 }
  0x41   : > { %830 = vmatprep.subr.bf16.mxu0 %v1902_v35 }
  0x42   : > { %1213 = vmatpush1.bf16.msra.mxu1 %v1948_v6  ;;  %v661_v6 = vrot.slane %v652_v4, %v2465_v31 }
  0x43   : > { %1214 = vmatprep.subr.bf16.mxu1 %v1953_v7 }
  0x44   : > { %831 = vmatpush1.bf16.msra.mxu0 %v1900_v36 }
  0x45   : > { %832 = vmatprep.subr.bf16.mxu0 %v1905_v37 }
  0x46   : > { %1215 = vmatpush1.bf16.msra.mxu1 %v1951_v8 }
  0x47   : > { %1216 = vmatprep.subr.bf16.mxu1 %v1956_v9 }
  0x48   : > { %833 = vmatpush1.bf16.msra.mxu0 %v1903_v38 }
  0x49   : > { %834 = vmatprep.subr.bf16.mxu0 %v1908_v39 }
  0x4a   : > { %1217 = vmatpush1.bf16.msra.mxu1 %v1954_v10 }
  0x4b   : > { %1218 = vmatprep.subr.bf16.mxu1 %v1959_v11 }
  0x4c   : > { %835 = vmatpush1.bf16.msra.mxu0 %v1906_v40 }
  0x4d   : > { %836 = vmatprep.subr.bf16.mxu0 %v1911_v41 }
  0x4e   : > { %1219 = vmatpush1.bf16.msra.mxu1 %v1957_v12 }
  0x4f   : > { %1220 = vmatprep.subr.bf16.mxu1 %v1962_v13 }
  0x50   : > { %837 = vmatpush1.bf16.msra.mxu0 %v1909_v42 }
  0x51   : > { %838 = vmatprep.subr.bf16.mxu0 %v1914_v43  ;;  %v1967_v43 = vld [vmem:[%s2661_s5 + $0xb0] ss:$12 sps:$4 sm:$0xff]  }
  0x52   : > { %1221 = vmatpush1.bf16.msra.mxu1 %v1960_v14 }
  0x53   : > { %1222 = vmatprep.subr.bf16.mxu1 %v1965_v15 }
  0x54   : > { %839 = vmatpush1.bf16.msra.mxu0 %v1912_v44 }
  0x55   : > { %840 = vmatprep.subr.bf16.mxu0 %v1917_v45  ;;  %v1971_v45 = vld [vmem:[%s2661_s5 + $0x158] ss:$12 sps:$4 sm:$0xff]  }
  0x56   : > { %1223 = vmatpush2.bf16.msra.mxu1 %v1963_v16 }
  0x57   : > { %1224 = vmatprep.subr.bf16.mxu1 %v1970_v17  ;;  %v945_v17 = vsub.s32 2, %v2456_v28 }
  0x58   : > { %841 = vmatpush2.bf16.msra.mxu0 %v1915_v46 }
  0x59   : > { %842 = vmatprep.subr.bf16.mxu0 %v1920_v47  ;;  %v1972_v47 = vld [vmem:[%s2661_s5 + $0x98] ss:$12 sps:$4 sm:$0xff]  }
  0x5a   : > { %1225 = vmatpush2.bf16.msra.mxu1 %v1968_v18  ;;  %v2538_v18 = vld [vmem:[%s2662_s6] sm:$0x7] }
  0x5b   : > { %1226 = vmatprep.subr.bf16.mxu1 %v1975_v19 }
  0x5c   : > { %843 = vmatpush2.bf16.msra.mxu0 %v1918_v48 }
  0x5d   : > { %844 = vmatprep.subr.bf16.mxu0 %v1923_v49  ;;  %v1976_v49 = vld [vmem:[%s2661_s5 + $0x140] ss:$12 sps:$4 sm:$0xff]  }
  0x5e   : > { %1227 = vmatpush2.bf16.msra.mxu1 %v1973_v20 }
  0x5f   : > { %1228 = vmatprep.subr.bf16.mxu1 %v1980_v21  ;;  %v946_v21 = vrot.slane %v2538_v18, %v945_v17 }
  0x60   : > { %845 = vmatpush2.bf16.msra.mxu0 %v1921_v50 }
  0x61   : > { %846 = vmatprep.subr.bf16.mxu0 %v1926_v51  ;;  %v1977_v51 = vld [vmem:[%s2661_s5 + $0x80] ss:$12 sps:$4 sm:$0xff]  }
  0x62   : > { %1229 = vmatpush2.bf16.msra.mxu1 %v1978_v22 }
  0x63   : > { %1230 = vmatprep.subr.bf16.mxu1 %v1985_v23 }
  0x64   : > { %847 = vmatpush2.bf16.msra.mxu0 %v1924_v52 }
  0x65   : > { %848 = vmatprep.subr.bf16.mxu0 %v1929_v53  ;;  %v1981_v53 = vld [vmem:[%s2661_s5 + $0x128] ss:$12 sps:$4 sm:$0xff]  }
  0x66   : > { %1231 = vmatpush2.bf16.msra.mxu1 %v1983_v24 }
  0x67   : > { %1232 = vmatprep.subr.bf16.mxu1 %v1990_v25 }
  0x68   : > { %849 = vmatpush2.bf16.msra.mxu0 %v1927_v54  ;;  %v1982_v54 = vld [vmem:[%s2661_s5 + $0x68] ss:$12 sps:$4 sm:$0xff]  }
  0x69   : > { %850 = vmatprep.subr.bf16.mxu0 %v1932_v55  ;;  %v1986_v55 = vld [vmem:[%s2661_s5 + $0x110] ss:$12 sps:$4 sm:$0xff]  }
  0x6a   : > { %1233 = vmatpush2.bf16.msra.mxu1 %v1988_v26 }
  0x6c   : > { %851 = vmatpush2.bf16.msra.mxu0 %v1930_v56  ;;  %v1987_v56 = vld [vmem:[%s2661_s5 + $0x50] ss:$12 sps:$4 sm:$0xff]  }
  0x6d   : > { %852 = vmatprep.subr.bf16.mxu0 %v1935_v57  ;;  %v1991_v57 = vld [vmem:[%s2661_s5 + $0xf8] ss:$12 sps:$4 sm:$0xff]  }
  0x70   : > { %853 = vmatpush2.bf16.msra.mxu0 %v1933_v58  ;;  %v1992_v58 = vld [vmem:[%s2661_s5 + $0x38] ss:$12 sps:$4 sm:$0xff]  }
  0x71   : > { %854 = vmatprep.subr.bf16.mxu0 %v1938_v59  ;;  %v1995_v59 = vld [vmem:[%s2661_s5 + $0xdc] ss:$12 sps:$4 sm:$0xff]  }
  0x72   : > { %1234 = vmatprep.subr.bf16.mxu1 %v1995_v59  ;;  %v2017_v59 = vld [vmem:[%s2665_s9 + $0x48] sm:$0xff]  }
  0x73   : > { %1235 = vmatpush2.bf16.msra.mxu1 %v1993_v61  ;;  %v2019_v61 = vld [vmem:[%s2665_s9 + $0x40] sm:$0xff]  }
  0x74   : > { %855 = vmatpush2.bf16.msra.mxu0 %v1936_v60  ;;  %v1996_v60 = vld [vmem:[%s2661_s5 + $0xe0] ss:$12 sps:$4 sm:$0xff]   ;;  %1236 = vmatprep.subr.bf16.mxu1 %v2000_v63  ;;  %v938_v63 = vrot.slane %v2538_v18, %v2459_v29 }
  0x75   : > { %1752 = vmatprep.subr.bf16.mxu0 %v1966_v3  ;;  %v2002_v3 = vld [vmem:[%s2661_s5 + $0x8] ss:$12 sps:$4 sm:$0xff]  }
  0x77   : > { %1237 = vmatpush2.bf16.msra.mxu1 %v1998_v1 }
  0xf5   : > { %v609_v34 = vpop.f32.mrf.mxu1 }
  0xf6   : > { %v610_v35 = vadd.f32 %v609_v34, %v488_v32 }
  0xf7   : > { %v611_v36 = vpop.f32.mrf.mxu1  ;;  %v2475_v46 = vpop.f32.mrf.mxu0 }
  0xf8   : > { %v612_v37 = vadd.f32 %v611_v36, %v492_v33  ;;  %v616_v38 = vmax.f32 %v610_v35, 0.0  ;;  %vm465_vm4 = vcmp.ge.f32.partialorder %v2475_v46, 15.5  ;;  %v2009_v46 = vld [vmem:[%s2665_s9 + $0x68] sm:$0xff]  }
  0xf9   : > { %v613_v39 = vpop.f32.mrf.mxu1  ;;  %v1814_v48 = vpop.f32.mrf.mxu0 }
  0xfa   : > { %v617_v40 = vmax.f32 %v612_v37, 0.0  ;;  %v618_v44 = vpack.c.bf16 %v616_v38, %v616_v38  ;;  %v1302_v38 = vld [vmem:[%s2664_s8] sm:$0xff]  ;;  %v2006_v48 = vld [vmem:[%s2665_s9 + $0x38] sm:$0xff]  }
  0xfb   : > { %v614_v41 = vpop.f32.mrf.mxu1  ;;  %v462_v50 = vpop.f32.mrf.mxu0  ;;  %v1720_v39 = vcombine.high %v1302_v38, %v1302_v38 }
  0xfc   : > { %v619_v42 = vpack.c.bf16 %v617_v40, %v617_v40  ;;  %v1719_v40 = vcombine.low %v1302_v38, %v1302_v38  ;;  %v2007_v50 = vld [vmem:[%s2665_s9 + $0x70] sm:$0xff]  }
  0xfd   : > { %v1815_v52 = vpop.f32.mrf.mxu0  ;;  %1721 = vmatprep.subr.msk.bf16.mxu1 %vm1311_vm5, %v1720_v39 }
  0xfe   : > { %856 = vmatprep.mubr.bf16.mxu0 %v619_v42  ;;  %v1313_v41 = vsel %vm1311_vm5, %v1719_v40, 0  ;;  %v2005_v42 = vld [vmem:[%s2665_s9 + $0x78] sm:$0xff]   ;;  %v2010_v52 = vld [vmem:[%s2665_s9 + $0x28] sm:$0xff]  }
  0xff   : > { %857 = vmatmul.mubr.bf16.vlgmr.msra.gmra.mxu0 %v618_v44 }
 0x100   : > { %1753 = vmatpush3.bf16.msra.mxu0 %v1967_v43 }
 0x101   : > { %1754 = vmatprep.subr.bf16.mxu0 %v1971_v45 }
 0x104   : > { %1755 = vmatpush3.bf16.msra.mxu0 %v1972_v47 }
 0x105   : > { %1756 = vmatprep.subr.bf16.mxu0 %v1976_v49 }
 0x108   : > { %1757 = vmatpush3.bf16.msra.mxu0 %v1977_v51  ;;  %v2008_v51 = vld [vmem:[%s2665_s9 + $0x30] sm:$0xff]  }
 0x109   : > { %1758 = vmatprep.subr.bf16.mxu0 %v1981_v53  ;;  %v2011_v53 = vld [vmem:[%s2665_s9 + $0x60] sm:$0xff]  }
 0x10c   : > { %1759 = vmatpush3.bf16.msra.mxu0 %v1982_v54  ;;  %v2012_v54 = vld [vmem:[%s2665_s9 + $0x20] sm:$0xff]  }
 0x10d   : > { %1760 = vmatprep.subr.bf16.mxu0 %v1986_v55  ;;  %v2013_v55 = vld [vmem:[%s2665_s9 + $0x58] sm:$0xff]  }
 0x110   : > { %1761 = vmatpush3.bf16.msra.mxu0 %v1987_v56  ;;  %v2014_v56 = vld [vmem:[%s2665_s9 + $0x18] sm:$0xff]  }
 0x111   : > { %1762 = vmatprep.subr.bf16.mxu0 %v1991_v57  ;;  %v2015_v57 = vld [vmem:[%s2665_s9 + $0x50] sm:$0xff]  }
 0x114   : > { %1763 = vmatpush3.bf16.msra.mxu0 %v1992_v58  ;;  %v2016_v58 = vld [vmem:[%s2665_s9 + $0x10] sm:$0xff]  }
 0x115   : > { %1764 = vmatprep.subr.bf16.mxu0 %v1996_v60  ;;  %v2018_v60 = vld [vmem:[%s2665_s9 + $0x8] sm:$0xff]  }
 0x118   : > { %1765 = vmatpush3.bf16.msra.mxu0 %v1997_v62  ;;  %v2020_v62 = vld [vmem:[%s2665_s9] sm:$0xff]  }
 0x119   : > { %1766 = vmatprep.subr.bf16.mxu0 %v2001_v0  ;;  %v942_v0 = vrot.slane %v2538_v18, %v2465_v31 }
 0x11c   : > { %1767 = vmatpush3.bf16.msra.mxu0 %v2002_v3 }
 0x1bf   : > { %v858_v7 = vpop.f32.mrf.mxu0 }
 0x1c0   : > { %v859_v8 = vadd.f32 %v858_v7, %v657_v5 }
 0x1c1   : > { %v860_v9 = vpop.f32.mrf.mxu0 }
 0x1c2   : > { %v861_v10 = vadd.f32 %v860_v9, %v661_v6  ;;  %v865_v11 = vmax.f32 %v859_v8, 0.0 }
 0x1c3   : > { %v862_v12 = vpop.f32.mrf.mxu0 }
 0x1c4   : > { %v866_v13 = vmax.f32 %v861_v10, 0.0  ;;  %v867_v16 = vpack.c.bf16 %v865_v11, %v865_v11 }
 0x1c5   : > { %v863_v14 = vpop.f32.mrf.mxu0 }
 0x1c6   : > { %v868_v15 = vpack.c.bf16 %v866_v13, %v866_v13 }
 0x1c8   : > { %1238 = vmatprep.mubr.bf16.mxu1 %v868_v15  ;;  %1279 = vmatprep.mubr.bf16.mxu0 %v868_v15 }
 0x1c9   : > { %1239 = vmatmul.mubr.bf16.vlgmr.msra.gmra.mxu1 %v867_v16  ;;  %1280 = vmatmul.mubr.bf16.vlgmr.msra.gmra.mxu0 %v867_v16 }
 0x1ca   : > { %1350 = vmatprep.mubr.bf16.mxu1 %v2087_v2  ;;  %1333 = vmatpush1.bf16.msra.mxu1 %v1313_v41 }
 0x1cb   : > { %1774 = vmatprep.subr.bf16.mxu1 %v2005_v42 }
 0x289   : > { %v2540_v19 = vpop.f32.mrf.mxu1  ;;  %v1768_v20 = vpop.f32.mrf.mxu0 }
 0x28a   : > { %v1241_v1 = vadd.f32 %v2540_v19, %v938_v63 }
 0x28b   : > { %v2543_v22 = vpop.f32.mrf.mxu1  ;;  %v1769_v23 = vpop.f32.mrf.mxu0 }
 0x28c   : > { %v1770_v24 = vadd.f32 %v1769_v23, %v1768_v20  ;;  %v1243_v4 = vadd.f32 %v2543_v22, %v942_v0 }
 0x28d   : > { %v1244_v25 = vpop.f32.mrf.mxu1  ;;  %v1771_v26 = vpop.f32.mrf.mxu0 }
 0x28e   : > { %v1282_v27 = vadd.f32 %v1770_v24, %v946_v21 }
 0x28f   : > { %v1245_v2 = vpop.f32.mrf.mxu1  ;;  %v1772_v28 = vpop.f32.mrf.mxu0 }
 0x290   : > { %v1287_v30 = vsel %vm465_vm4, -1e+09, %v1282_v27 }
 0x291   : > { %v1289_v32 = vsel %vm1288_vm3, %v1287_v30, -inf }
 0x292   : > { %1290 = vmax.xlane.f32.xlu0 %v1289_v32 }
 0x31b   : > { %v1291_v33 = vpop.xlane.xlu0 %1290 }
 0x31c   : > { %v1292_v34 = vsub.f32 %v1287_v30, %v1291_v33 }
 0x31e   : > { %v1293_v35 = vmul.f32 1.442695, %v1292_v34 }
 0x320   : > { %2021 = vpow2.f32 %v1293_v35 }
 0x32d   : > { %v2022_v36 = vpop.eup %2021 }
 0x32e   : > { %v1295_v37 = vsel %vm1288_vm3, %v2022_v36, 0.0 }
 0x32f   : > { %1296 = vadd.xlane.f32.xlu0 %v1295_v37 }
 0x3b8   : > { %v1297_v43 = vpop.xlane.xlu0 %1296 }
 0x3b9   : > { %2023 = vrcp.f32 %v1297_v43 }
 0x3c6   : > { %v2024_v44 = vpop.eup %2023 }
 0x3c7   : > { %v1299_v45 = vmul.f32 %v2024_v44, %v2022_v36 }
 0x3c9   : > { %v1300_v47 = vsel %vm465_vm4, 0.0, %v1299_v45 }
 0x3ca   : > { %v1301_v49 = vpack.c.bf16 %v1300_v47, %v1300_v47 }
 0x3cc   : > { %1722 = vmatmul.mubr.msk.bf16.vlgmr.msra.gmra.mxu1 %vm1288_vm3, %v1301_v49 }
 0x3cd   : > { %1775 = vmatpush3.bf16.msra.mxu1 %v2006_v48 }
 0x3ce   : > { %1776 = vmatprep.subr.bf16.mxu1 %v2007_v50 }
 0x3d1   : > { %1777 = vmatpush3.bf16.msra.mxu1 %v2008_v51 }
 0x3d2   : > { %1778 = vmatprep.subr.bf16.mxu1 %v2009_v46 }
 0x3d5   : > { %1779 = vmatpush3.bf16.msra.mxu1 %v2010_v52 }
 0x3d6   : > { %1780 = vmatprep.subr.bf16.mxu1 %v2011_v53 }
 0x3d9   : > { %1781 = vmatpush3.bf16.msra.mxu1 %v2012_v54 }
 0x3da   : > { %1782 = vmatprep.subr.bf16.mxu1 %v2013_v55 }
 0x3dd   : > { %1783 = vmatpush3.bf16.msra.mxu1 %v2014_v56 }
 0x3de   : > { %1784 = vmatprep.subr.bf16.mxu1 %v2015_v57 }
 0x3e1   : > { %1785 = vmatpush3.bf16.msra.mxu1 %v2016_v58 }
 0x3e2   : > { %1786 = vmatprep.subr.bf16.mxu1 %v2017_v59 }
 0x3e5   : > { %1787 = vmatpush3.bf16.msra.mxu1 %v2018_v60 }
 0x3e6   : > { %1788 = vmatprep.subr.bf16.mxu1 %v2019_v61 }
 0x3e9   : > { %1789 = vmatpush3.bf16.msra.mxu1 %v2020_v62 }
 0x48c   : > { %v1352_v3 = vpop.f32.mrf.mxu1 }
 0x48d   : > { %v1359_v5 = vmul.f32 %v1352_v3, %v1241_v1 }
 0x48e   : > { %v1354_v6 = vpop.f32.mrf.mxu1 }
 0x48f   : > { %v1360_v7 = vmul.f32 %v1354_v6, %v1243_v4  ;;  %v1361_v10 = vpack.c.bf16 %v1359_v5, %v1359_v5 }
 0x490   : > { %v1356_v8 = vpop.f32.mrf.mxu1 }
 0x491   : > { %v1362_v9 = vpack.c.bf16 %v1360_v7, %v1360_v7 }
 0x492   : > { %v1357_v11 = vpop.f32.mrf.mxu1 }
 0x493   : > { %1523 = vmatprep.mubr.bf16.mxu1 %v1362_v9 }
 0x494   : > { %1524 = vmatmul.mubr.bf16.vlgmr.msra.gmra.mxu1 %v1361_v10 }
 0x554   : > { %v1790_v29 = vpop.f32.mrf.mxu1 }
 0x556   : > { %v1791_v31 = vpop.f32.mrf.mxu1 }
 0x557   : > { %v1792_v12 = vadd.f32 %v1791_v31, %v1790_v29 }
 0x558   : > { %v1793_v13 = vpop.f32.mrf.mxu1 }
 0x559   : > { %1532 = vst.msk [vmem:[%s350_s12] sm:$0xff] %vm1531_vm6, %v1792_v12 }
 0x55a   : > { %v1794_v14 = vpop.f32.mrf.mxu1 }
 0x55b   : > { %2038 = shalt.err (!%p2035_p3)
}
 0x55c   : > { %s2039_s22 = scalar_lea.hbm %s2615_s21, 128  ;;  %s2043_s12 = scalar_lea.hbm %s2666_s10, 256 }
 0x55d   : > { %p2040_p4 = scmp.ne.s32.totalorder %s2615_s21, %s2039_s22  ;;  %p2044_p9 = scmp.lt.s32.totalorder %s2615_s21, %s2666_s10 }
 0x55e   : > { %p2045_p10 = scmp.lt.s32.totalorder %s2043_s12, %s2039_s22 }
 0x55f   : > { %p2041_p7 = pnand %p2040_p4, %p2185_p5 }
 0x560   : > { %p2046_p11 = por %p2045_p10, %p2044_p9 }
 0x561   : > { %p2042_p8 = pneg %p2041_p7 }
 0x563   : > { %p2047_p12 = pnand %p2046_p11, %p2042_p8 }
 0x565   : > { %2050 = shalt.err (!%p2047_p12)
}
 0x566   : > { %1816 = dma.vmem_to_hbm [thread:$0]  (%p2185_p5), %s2617_s18, 128, %s2615_s21, %s1534_s26  }
 0x567 PF: > { %p1822_p13 = scmp.ge.s32.totalorder %s2085_s16, 2  ;;  %s1559_s17 = sand.u32 1, %s2073_s13  }
 0x568   : > { %s1560_s27 = scalar_lea.sflag [#allocation3], %s1559_s17 }
 0x569   : > { %p1819_p0 = pnand %p1822_p13, %p2189_p6 }
 0x56b   : > { %p1820_p1 = pneg %p1819_p0 }
 0x56d   : > { %2068 = dma.done.wait (%p1820_p1), %s1560_s27, 128  }
 0x56e   : > { %2070 = vsyncadd (%p1820_p1), %s1560_s27, 4294967168  ;;  %s2670_s28 = sld [smem:[#allocation5_spill]]  ;;  %p20_p2 = scmp.ge.s32.totalorder %s2172_s19, 4  }
 0x56f   : > { %s2671_s13 = smov %s2077_s14  ;;  %s2672_s14 = smov %s2081_s15 }
 0x570   : > { %s2674_s16 = smov %s2172_s19  ;;  %22 = sbr.rel (!%p20_p2) target bundleno = 3 (0x3), region = 95 }
 0x574   : > { %s2673_s15 = smov %s2670_s28 }
 0x575   :  { %1565 = vsyncpa [#allocation3], 1 }
 0x576   :  { %1567 = vsyncpa [#allocation3 + $0x1], 1 }

</bundles_post_ra>
